<compile_context>
chip_gen: v7x
topology: tpu7x:2x2x1
jax: 0.10.0
libtpu: 0.0.40
codegen_flags: <defaults>
</compile_context>

<pallas_src>
import functools

import jax
import jax.numpy as jnp
from jax.experimental import pallas as pl
from jax.experimental.pallas import tpu as pltpu


_BLOCK_BYTE_TARGET = 2 * 1024 * 1024   # ~1-4 MiB blocks -> ~85% of HBM roofline (measured sweep)
_MIN_ROW_TILE = 32                     # lcm of f32/bf16/int8 sublane tiles (8/16/32)


def _vmem_budget_bytes():
    """Per-generation scoped-VMEM request (v7x: 64 MiB physical; v5e/v6e: 128 MiB)."""
    cap = 64 << 20                     # v7x-safe floor if the query is unavailable
    try:
        cap = int(pltpu.get_tpu_info().vmem_capacity_bytes)
    except Exception:
        pass
    return min(cap * 3 // 4, 96 << 20)


def _lane_pad(c):
    return ((c + 127) // 128) * 128


def _choose_row_tile(n_rows, stream_bytes_per_row, vmem_bytes_per_row, vmem_budget):
    """Row tile: big enough (byte target) to amortize the ~0.35us/step grid overhead,
    small enough that double-buffered streams + f32 temporaries + accumulator fit VMEM."""
    target = max(1, _BLOCK_BYTE_TARGET // max(1, stream_bytes_per_row))
    fit = max(1, int(vmem_budget * 0.8) // max(1, vmem_bytes_per_row))
    tile = min(target, fit)
    if n_rows <= max(tile, _MIN_ROW_TILE):
        return n_rows                  # single full-extent block (always a legal block shape)
    return max(_MIN_ROW_TILE, (tile // _MIN_ROW_TILE) * _MIN_ROW_TILE)


def _partitioned_grid(n_rows, tile, num_parts):
    """Split row blocks into `num_parts` contiguous chunks.  Leading 'parallel' axis ->
    sharded across TensorCores on v7x/megacore; a plain (cheap) loop on v5e/v6e."""
    nblocks = pl.cdiv(n_rows, tile)
    parts = max(1, min(num_parts, nblocks))
    spp = pl.cdiv(nblocks, parts)      # steps per part (inner 'arbitrary' reduction axis)
    return nblocks, parts, spp


# ---------------------------------------------------------------------------
# Weighted CE  (weights is not None path of the PyTorch module)
# ---------------------------------------------------------------------------
def _weighted_ce_kernel(logits_ref, side_ref, out_ref, acc_ref, *,
                        n_true, tile_n, steps_per_part):
    part = pl.program_id(0)
    step = pl.program_id(1)

    @pl.when(step == 0)
    def _init():
        acc_ref[...] = jnp.zeros_like(acc_ref)

    logits = logits_ref[...].astype(jnp.float32)           # (tile_n, C) f32
    side = side_ref[...]                                   # (tile_n, 2) f32: [weight, target]
    w = side[:, 0:1]
    t = side[:, 1:2].astype(jnp.int32)                     # exact for class ids < 2**24
    tn, c = logits.shape

    # numerically stable log-softmax pieces (per row)
    m = jnp.max(logits, axis=1, keepdims=True)
    lse = jnp.log(jnp.sum(jnp.exp(logits - m), axis=1, keepdims=True)) + m
    # gather logits[i, targets[i]] via one-hot mask (no dynamic gather on TPU)
    cols = jax.lax.broadcasted_iota(jnp.int32, (tn, c), 1)
    sel = jnp.sum(jnp.where(cols == t, logits, 0.0), axis=1, keepdims=True)
    per_sample = w * (lse - sel)                           # = -w * log_softmax[target]

    # mask rows of partial / phantom tail blocks (where-select: NaN/Inf never propagate)
    blk = part * steps_per_part + step                     # un-clamped global block id
    rows = jax.lax.broadcasted_iota(jnp.int32, (tn, 1), 0) + blk * tile_n
    acc_ref[...] += jnp.where(rows < n_true, per_sample, 0.0)

    @pl.when(step == steps_per_part - 1)
    def _finalize():
        out_ref[0, 0] = jnp.sum(acc_ref[...])


def weighted_cross_entropy(logits, targets, weights, tile_n=None, num_parts=2):
    """logits: (N, C) float (f32/bf16), targets: (N,) int, weights: (N,) float -> scalar."""
    n, c = logits.shape
    # pack the two tiny per-sample streams into one (N, 2) side array -> one side DMA/step
    side = jnp.stack([weights.astype(jnp.float32),
                      targets.astype(jnp.float32)], axis=1)

    vmem_budget = _vmem_budget_bytes()
    itemsize = jnp.dtype(logits.dtype).itemsize
    c_pad = _lane_pad(c)
    if tile_n is None:
        stream = c_pad * itemsize                          # logits stream per row
        vmem_row = (2 * c_pad * itemsize                   # double-buffered logits blocks
                    + 6 * c_pad * 4                        # in-kernel f32/int32 temporaries
                    + 2 * 128 * 4                          # double-buffered side blocks (lane-padded)
                    + 128 * 4)                             # (tile,1) f32 accumulator (lane-padded)
        tile_n = _choose_row_tile(n, stream, vmem_row, vmem_budget)
    nblocks, parts, spp = _partitioned_grid(n, tile_n, num_parts)

    def blk_map(p, i):
        return (jnp.minimum(p * spp + i, nblocks - 1), 0)  # clamp phantom tail blocks

    kernel = functools.partial(_weighted_ce_kernel, n_true=n, tile_n=tile_n,
                               steps_per_part=spp)
    partials = pl.pallas_call(
        kernel,
        out_shape=jax.ShapeDtypeStruct((parts, 1), jnp.float32),
        grid=(parts, spp),
        in_specs=[
            pl.BlockSpec((tile_n, c), blk_map),
            pl.BlockSpec((tile_n, 2), blk_map),
        ],
        out_specs=pl.BlockSpec((1, 1), lambda p, i: (p, 0), memory_space=pltpu.SMEM),
        scratch_shapes=[pltpu.VMEM((tile_n, 1), jnp.float32)],
        compiler_params=pltpu.CompilerParams(
            dimension_semantics=("parallel", "arbitrary"),
            vmem_limit_bytes=vmem_budget,
        ),
    )(logits, side)
    return jnp.sum(partials) / jnp.float32(n)


# ---------------------------------------------------------------------------
# Binary cross entropy  (weights is None path of the PyTorch module)
# ---------------------------------------------------------------------------
def _bce_kernel(p_ref, t_ref, out_ref, acc_ref, *, rows_true, tile_r, steps_per_part):
    part = pl.program_id(0)
    step = pl.program_id(1)

    @pl.when(step == 0)
    def _init():
        acc_ref[...] = jnp.zeros_like(acc_ref)

    p = p_ref[...].astype(jnp.float32)
    t = t_ref[...].astype(jnp.float32)
    tr, w = p.shape

    # PyTorch BCELoss clamps log terms at -100 for numerical safety
    log_p = jnp.maximum(jnp.log(p), -100.0)
    log_1mp = jnp.maximum(jnp.log(1.0 - p), -100.0)
    loss = -(t * log_p + (1.0 - t) * log_1mp)

    blk = part * steps_per_part + step
    rows = jax.lax.broadcasted_iota(jnp.int32, (tr, w), 0) + blk * tile_r
    acc_ref[...] += jnp.where(rows < rows_true, loss, 0.0)  # where-select before accumulate

    @pl.when(step == steps_per_part - 1)
    def _finalize():
        out_ref[0, 0] = jnp.sum(acc_ref[...])


def binary_cross_entropy(probs, targets, tile_r=None, num_parts=2):
    """probs, targets: same-shaped floats in [0,1] -> scalar mean BCE."""
    total = int(probs.size)
    # BCE is elementwise: flatten to a lane-dense (rows, 128) slab so small/odd C does
    # not waste 128-lane vregs or DMA bandwidth.
    if total % 128 == 0:
        p2 = probs.reshape(total // 128, 128)
        t2 = targets.reshape(total // 128, 128)
    elif probs.ndim >= 2:
        p2 = probs.reshape(-1, probs.shape[-1])
        t2 = targets.reshape(-1, targets.shape[-1])
    else:
        # TODO(synk): chunked/padded path for large 1-D inputs not divisible by 128.
        p2 = probs.reshape(1, total)
        t2 = targets.reshape(1, total)

    rows, width = p2.shape
    w_pad = _lane_pad(width)
    p_item = jnp.dtype(p2.dtype).itemsize
    t_item = jnp.dtype(t2.dtype).itemsize
    vmem_budget = _vmem_budget_bytes()
    if tile_r is None:
        stream = w_pad * p_item
        vmem_row = (2 * w_pad * p_item + 2 * w_pad * t_item  # double-buffered input streams
                    + 7 * w_pad * 4                          # f32/int32 temporaries
                    + w_pad * 4)                             # tile-shaped f32 accumulator
        tile_r = _choose_row_tile(rows, stream, vmem_row, vmem_budget)
    nblocks, parts, spp = _partitioned_grid(rows, tile_r, num_parts)

    def blk_map(p, i):
        return (jnp.minimum(p * spp + i, nblocks - 1), 0)

    kernel = functools.partial(_bce_kernel, rows_true=rows, tile_r=tile_r,
                               steps_per_part=spp)
    partials = pl.pallas_call(
        kernel,
        out_shape=jax.ShapeDtypeStruct((parts, 1), jnp.float32),
        grid=(parts, spp),
        in_specs=[
            pl.BlockSpec((tile_r, width), blk_map),
            pl.BlockSpec((tile_r, width), blk_map),
        ],
        out_specs=pl.BlockSpec((1, 1), lambda p, i: (p, 0), memory_space=pltpu.SMEM),
        scratch_shapes=[pltpu.VMEM((tile_r, width), jnp.float32)],
        compiler_params=pltpu.CompilerParams(
            dimension_semantics=("parallel", "arbitrary"),
            vmem_limit_bytes=vmem_budget,
        ),
    )(p2, t2)
    return jnp.sum(partials) / jnp.float32(total)


def weighted_cross_entropy_loss(inputs, targets, weights):
    """Mirror of WeightedCrossEntropyLoss.forward."""
    if weights is None:
        return binary_cross_entropy(inputs, targets)
    return weighted_cross_entropy(inputs, targets, weights)


if __name__ == "__main__":
    key = jax.random.PRNGKey(0)
    k1, k2, k3, k4, k5, k6, k7, k8 = jax.random.split(key, 8)

    # ------------------ weighted CE path (single full-extent block) ------------------
    N, C = 8, 32
    logits = jax.random.normal(k1, (N, C), dtype=jnp.float32)
    targets = jax.random.randint(k2, (N,), 0, C, dtype=jnp.int32)
    weights = jax.random.uniform(k3, (N,), dtype=jnp.float32, minval=0.1, maxval=2.0)

    loss = jax.block_until_ready(weighted_cross_entropy_loss(logits, targets, weights))
    log_probs = jax.nn.log_softmax(logits, axis=1)
    ref = jnp.mean(-weights * log_probs[jnp.arange(N), targets])
    assert jnp.allclose(loss, ref, atol=1e-5, rtol=1e-5), (loss, ref)

    # ------ weighted CE, bf16 logits, 2-part grid with partial last tile ------
    N2 = 40
    logits2 = jax.random.normal(k4, (N2, C)).astype(jnp.bfloat16)
    targets2 = jax.random.randint(k5, (N2,), 0, C, dtype=jnp.int32)
    weights2 = jax.random.uniform(k6, (N2,), dtype=jnp.float32, minval=0.1, maxval=2.0)

    loss2 = jax.block_until_ready(
        weighted_cross_entropy(logits2, targets2, weights2, tile_n=16))  # 3 blocks, 2 parts
    lp2 = jax.nn.log_softmax(logits2.astype(jnp.float32), axis=1)
    ref2 = jnp.mean(-weights2 * lp2[jnp.arange(N2), targets2])
    assert jnp.allclose(loss2, ref2, atol=1e-4, rtol=1e-4), (loss2, ref2)

    # ------------- weights=None path (BCE), lane-dense flat slab, single block -------------
    probs = jax.nn.sigmoid(jax.random.normal(k7, (N, C), dtype=jnp.float32))
    bin_targets = (jax.random.uniform(k2, (N, C)) > 0.5).astype(jnp.float32)
    bce = jax.block_until_ready(weighted_cross_entropy_loss(probs, bin_targets, None))
    ref_bce = jnp.mean(
        -(bin_targets * jnp.log(probs) + (1.0 - bin_targets) * jnp.log(1.0 - probs)))
    assert jnp.allclose(bce, ref_bce, atol=1e-5, rtol=1e-5), (bce, ref_bce)

    # ------------- BCE, 2-part grid with partial last tile (flat slab (10,128)) -------------
    probs3 = jax.nn.sigmoid(jax.random.normal(k8, (N2, C), dtype=jnp.float32))
    bin_targets3 = (jax.random.uniform(k5, (N2, C)) > 0.5).astype(jnp.float32)
    bce3 = jax.block_until_ready(binary_cross_entropy(probs3, bin_targets3, tile_r=8))
    ref_bce3 = jnp.mean(
        -(bin_targets3 * jnp.log(probs3) + (1.0 - bin_targets3) * jnp.log(1.0 - probs3)))
    assert jnp.allclose(bce3, ref_bce3, atol=1e-5, rtol=1e-5), (bce3, ref_bce3)

    print("KERNEL_OK")
</pallas_src>

<mosaic_0001>
module attributes {stable_mosaic.version = 11 : i64} {
  func.func @_weighted_ce_kernel(%arg0: i32, %arg1: i32, %arg2: memref<8x32xf32, #tpu.memory_space<vmem>>, %arg3: memref<8x2xf32, #tpu.memory_space<vmem>>, %arg4: memref<1x1xf32, #tpu.memory_space<smem>>, %arg5: memref<8x1xf32, #tpu.memory_space<vmem>>) attributes {dimension_semantics = [#tpu.dimension_semantics<parallel>, #tpu.dimension_semantics<arbitrary>], iteration_bounds = array<i64: 1, 1>, scalar_prefetch = 0 : i64, scratch_operands = 1 : i64, tpu.core_type = #tpu.core_type<tc>, window_params = [{transform_indices = @transform_0, window_bounds = array<i64: 8, 32>}, {transform_indices = @transform_1, window_bounds = array<i64: 8, 2>}, {transform_indices = @transform_2, window_bounds = array<i64: 1, 1>}]} {
    %c0_i32 = arith.constant 0 : i32
    %0 = arith.cmpi eq, %arg1, %c0_i32 : i32
    %1 = arith.extui %0 : i1 to i32
    %c0_i32_0 = arith.constant 0 : i32
    %2 = arith.cmpi ne, %1, %c0_i32_0 : i32
    scf.if %2 {
      %cst_15 = arith.constant 0.000000e+00 : f32
      %42 = vector.broadcast %cst_15 : f32 to vector<8x1xf32>
      %c0_16 = arith.constant 0 : index
      %c0_17 = arith.constant 0 : index
      %43 = vector.load %arg5[%c0_16, %c0_17] : memref<8x1xf32, #tpu.memory_space<vmem>>, vector<8x1xf32>
      tpu.vector_store %arg5[%c0_16, %c0_17], %42 {strides = array<i32>} : memref<8x1xf32, #tpu.memory_space<vmem>>, vector<8x1xf32>,
    } else {
    }
    %c0 = arith.constant 0 : index
    %c0_1 = arith.constant 0 : index
    %3 = vector.load %arg2[%c0, %c0_1] : memref<8x32xf32, #tpu.memory_space<vmem>>, vector<8x32xf32>
    %c0_2 = arith.constant 0 : index
    %c0_3 = arith.constant 0 : index
    %4 = vector.load %arg3[%c0_2, %c0_3] : memref<8x2xf32, #tpu.memory_space<vmem>>, vector<8x2xf32>
    %5 = vector.extract_strided_slice %4 {offsets = [0, 0], sizes = [8, 1], strides = [1, 1]} : vector<8x2xf32> to vector<8x1xf32>
    %6 = vector.extract_strided_slice %4 {offsets = [0, 1], sizes = [8, 1], strides = [1, 1]} : vector<8x2xf32> to vector<8x1xf32>
    %7 = arith.fptosi %6 : vector<8x1xf32> to vector<8x1xi32>
    %cst = arith.constant dense<0xFF800000> : vector<8xf32>
    %8 = vector.multi_reduction <maximumf>, %3, %cst [1] : vector<8x32xf32> to vector<8xf32>
    %9 = vector.shape_cast %8 : vector<8xf32> to vector<8x1xf32>
    %10 = vector.broadcast %9 : vector<8x1xf32> to vector<8x32xf32>
    %11 = arith.subf %3, %10 : vector<8x32xf32>
    %12 = math.exp %11 : vector<8x32xf32>
    %cst_4 = arith.constant dense<0.000000e+00> : vector<8xf32>
    %13 = vector.multi_reduction <add>, %12, %cst_4 [1] : vector<8x32xf32> to vector<8xf32>
    %14 = vector.shape_cast %13 : vector<8xf32> to vector<8x1xf32>
    %15 = math.log %14 : vector<8x1xf32>
    %16 = arith.addf %15, %9 : vector<8x1xf32>
    %17 = tpu.iota {dimensions = array<i32: 1>} : vector<8x32xi32>
    %18 = vector.broadcast %7 : vector<8x1xi32> to vector<8x32xi32>
    %19 = arith.cmpi eq, %17, %18 : vector<8x32xi32>
    %cst_5 = arith.constant 0.000000e+00 : f32
    %20 = vector.broadcast %cst_5 : f32 to vector<8x32xf32>
    %21 = arith.select %19, %3, %20 : vector<8x32xi1>, vector<8x32xf32>
    %cst_6 = arith.constant dense<0.000000e+00> : vector<8xf32>
    %22 = vector.multi_reduction <add>, %21, %cst_6 [1] : vector<8x32xf32> to vector<8xf32>
    %23 = vector.shape_cast %22 : vector<8xf32> to vector<8x1xf32>
    %24 = arith.subf %16, %23 : vector<8x1xf32>
    %25 = arith.mulf %5, %24 : vector<8x1xf32>
    %c1_i32 = arith.constant 1 : i32
    %26 = arith.muli %arg0, %c1_i32 : i32
    %27 = arith.addi %26, %arg1 : i32
    %28 = tpu.iota {dimensions = array<i32: 0>} : vector<8x1xi32>
    %c8_i32 = arith.constant 8 : i32
    %29 = arith.muli %27, %c8_i32 : i32
    %30 = vector.broadcast %29 : i32 to vector<8x1xi32>
    %31 = arith.addi %28, %30 : vector<8x1xi32>
    %c0_7 = arith.constant 0 : index
    %c0_8 = arith.constant 0 : index
    %32 = vector.load %arg5[%c0_7, %c0_8] : memref<8x1xf32, #tpu.memory_space<vmem>>, vector<8x1xf32>
    %c8_i32_9 = arith.constant 8 : i32
    %33 = vector.broadcast %c8_i32_9 : i32 to vector<8x1xi32>
    %34 = arith.cmpi slt, %31, %33 : vector<8x1xi32>
    %cst_10 = arith.constant 0.000000e+00 : f32
    %35 = vector.broadcast %cst_10 : f32 to vector<8x1xf32>
    %36 = arith.select %34, %25, %35 : vector<8x1xi1>, vector<8x1xf32>
    %37 = arith.addf %32, %36 : vector<8x1xf32>
    %c0_11 = arith.constant 0 : index
    %c0_12 = arith.constant 0 : index
    %38 = vector.load %arg5[%c0_11, %c0_12] : memref<8x1xf32, #tpu.memory_space<vmem>>, vector<8x1xf32>
    tpu.vector_store %arg5[%c0_11, %c0_12], %37 {strides = array<i32>} : memref<8x1xf32, #tpu.memory_space<vmem>>, vector<8x1xf32>,
    %c0_i32_13 = arith.constant 0 : i32
    %39 = arith.cmpi eq, %arg1, %c0_i32_13 : i32
    %40 = arith.extui %39 : i1 to i32
    %c0_i32_14 = arith.constant 0 : i32
    %41 = arith.cmpi ne, %40, %c0_i32_14 : i32
    scf.if %41 {
      %c0_15 = arith.constant 0 : index
      %c0_16 = arith.constant 0 : index
      %42 = vector.load %arg5[%c0_15, %c0_16] : memref<8x1xf32, #tpu.memory_space<vmem>>, vector<8x1xf32>
      %43 = vector.shape_cast %42 : vector<8x1xf32> to vector<1x8x1xf32>
      %cst_17 = arith.constant dense<0.000000e+00> : vector<1xf32>
      %44 = vector.multi_reduction <add>, %43, %cst_17 [1, 2] : vector<1x8x1xf32> to vector<1xf32>
      %45 = vector.shape_cast %44 : vector<1xf32> to vector<1x1x1xf32>
      %46 = vector.extract %45[0, 0, 0] : f32 from vector<1x1x1xf32>
      %c0_18 = arith.constant 0 : index
      %c0_19 = arith.constant 0 : index
      %47 = memref.load %arg4[%c0_18, %c0_19] : memref<1x1xf32, #tpu.memory_space<smem>>
      memref.store %46, %arg4[%c0_18, %c0_19] : memref<1x1xf32, #tpu.memory_space<smem>>
    } else {
    }
    return
  }
  func.func @transform_0(%arg0: i32, %arg1: i32) -> (i32, i32) {
    %c1_i32 = arith.constant 1 : i32
    %0 = arith.muli %arg0, %c1_i32 : i32
    %1 = arith.addi %0, %arg1 : i32
    %c0_i32 = arith.constant 0 : i32
    %2 = arith.minsi %1, %c0_i32 : i32
    %c0_i32_0 = arith.constant 0 : i32
    %c0_i32_1 = arith.constant 0 : i32
    return %2, %c0_i32_0 : i32, i32
  }
  func.func @transform_1(%arg0: i32, %arg1: i32) -> (i32, i32) {
    %c1_i32 = arith.constant 1 : i32
    %0 = arith.muli %arg0, %c1_i32 : i32
    %1 = arith.addi %0, %arg1 : i32
    %c0_i32 = arith.constant 0 : i32
    %2 = arith.minsi %1, %c0_i32 : i32
    %c0_i32_0 = arith.constant 0 : i32
    %c0_i32_1 = arith.constant 0 : i32
    return %2, %c0_i32_0 : i32, i32
  }
  func.func @transform_2(%arg0: i32, %arg1: i32) -> (i32, i32) {
    %c0_i32 = arith.constant 0 : i32
    %c0_i32_0 = arith.constant 0 : i32
    return %arg0, %c0_i32 : i32, i32
  }
}

</mosaic_0001>

<bundles_post_ra>
// kernel: tpu_custom_call.1
= control target key start
LH: loop header
LB: loop body
LE: loop exit
PB: predicated region body
PF: predicated region fallthrough
CT: control target
= control target key end

     0   :  { %vm75_vm0 = vcmask 261120   ;;  %s216_s0 = inlined_call_operand.vmem [shape: f32[8,32], index: 0, kind: input, shape index: {}]   ;;  %s217_s1 = inlined_call_operand.vmem [shape: f32[8,2], index: 1, kind: input, shape index: {}]   ;;  %s218_s2 = inlined_call_operand.hbm [shape: f32[1,1], index: 2, kind: output, shape index: {}]  }
   0x1   :  { %v72_v0 = vld [vmem:[%s216_s0] sm:$0xff] }
   0x2   :  { %7 = vsyncpa [#allocation4], 0  ;;  %v76_v1 = vsel %vm75_vm0, %v72_v0, -inf  ;;  %v177_v2 = vmov 1   ;;  %v73_v3 = vld [vmem:[%s217_s1] sm:$0xff]  ;;  %v88_v9 = vlaneseq  ;;  %vm70_vm2 = vcmask 7168  }
   0x3   :  { %160 = vset.pattern.permute.xlu0 %v177_v2  ;;  %v153_v4 = vtrunc.f32 %v73_v3  ;;  %v178_v16 = vmov 0.0   ;;  %s165_s14 = scalar_lea.hbm %s218_s2, 16 }
   0x4   :  { %77 = vmax.xlane.f32.xlu0 %v76_v1  ;;  %v89_v10 = vand.u32 127, %v88_v9  ;;  %71 = vst.msk [vmem:[#allocation2] sm:$0xff] %vm70_vm2, %v178_v16  ;;  %p166_p0 = scmp.ne.s32.totalorder %s218_s2, %s165_s14  ;;  %p169_p1 = scmp.lt.u32.totalorder %s165_s14, %s218_s2 }
   0x5   :  { %v154_v5 = vcvt.f32.s32 %v153_v4 }
   0x6   :  { %p171_p2 = pnand %p169_p1, %p166_p0 }
   0xb   :  { %v106_v23 = vld [vmem:[#allocation2] sm:$0xff] }
  0x1a   :  { %91 = vperm.xlu0 %160, %v154_v5  }
  0x91   :  { %v78_v6 = vpop.xlane.xlu0 %77 }
  0x92   :  { %v79_v7 = vsub.f32 %v72_v0, %v78_v6 }
  0x94   :  { %v80_v8 = vmul.f32 1.442695, %v79_v7 }
  0x96   :  { %161 = vpow2.f32 %v80_v8 }
  0x99   :  { %v92_v11 = vpop.permute.xlu0 %91 }
  0x9a   :  { %vm93_vm1 = vcmp.eq.s32.totalorder %v89_v10, %v92_v11 }
  0x9b   :  { %v94_v13 = vsel %vm93_vm1, %v72_v0, 0.0 }
  0x9c   :  { %v95_v15 = vsel %vm75_vm0, %v94_v13, 0.0 }
  0xa0   :  { %v162_v12 = vpop.eup %161 }
  0xa1   :  { %v82_v14 = vsel %vm75_vm0, %v162_v12, 0.0 }
  0xa2   :  { %83 = vadd.xlane.f32.xlu1 %v82_v14 }
  0xa6   :  { %96 = vadd.xlane.f32.xlu1 %v95_v15 }
 0x12f   :  { %v84_v17 = vpop.xlane.xlu1 %83 }
 0x130   :  { %163 = vlog2.f32 %v84_v17 }
 0x133   :  { %v97_v20 = vpop.xlane.xlu1 %96 }
 0x13a   :  { %v164_v18 = vpop.eup %163 }
 0x13b   :  { %v86_v19 = vmul.f32 0.6931472, %v164_v18 }
 0x13d   :  { %v87_v21 = vadd.f32 %v86_v19, %v78_v6 }
 0x13f   :  { %v98_v22 = vsub.f32 %v87_v21, %v97_v20 }
 0x141   :  { %v99_v24 = vmul.f32 %v98_v22, %v73_v3 }
 0x143   :  { %v109_v25 = vadd.f32 %v106_v23, %v99_v24 }
 0x145   :  { %111 = vst.msk [vmem:[#allocation2] sm:$0xff] %vm70_vm2, %v109_v25 }
 0x14c   :  { %v115_v26 = vld [vmem:[#allocation2] sm:$0xff] }
 0x14d   :  { %v116_v27 = vsel %vm70_vm2, %v115_v26, 0.0 }
 0x14e   :  { %117 = vadd.xlane.f32.xlu1 %v116_v27 }
 0x1db   :  { %v118_v28 = vpop.xlane.xlu1 %117 }
 0x1dc   :  { %v119_v29 = vrot.slane %v118_v28, 4 }
 0x1de   :  { %v120_v30 = vadd.f32 %v119_v29, %v118_v28 }
 0x1e0   :  { %v121_v31 = vrot.slane %v120_v30, 2 }
 0x1e2   :  { %v122_v32 = vadd.f32 %v121_v31, %v120_v30 }
 0x1e4   :  { %v123_v33 = vrot.slane %v122_v32, 1 }
 0x1e6   :  { %v124_v34 = vadd.f32 %v123_v33, %v122_v32 }
 0x1e8   :  { %155 = vpush %v124_v34 }
 0x219   :  { %s156_s0 = spop %155 }
 0x21a   :  { %127 = sst [smem:[#allocation3]] %s156_s0 }
 0x21b   :  { %174 = shalt.err (!%p171_p2)
}
 0x21c   :  { %s179_s19 = smov [#allocation3]  }
 0x21d   :  { %135 = dma.smem_to_hbm %s179_s19, 16, %s218_s2, [#allocation4]  }
 0x21e   :  { %175 = dma.done.wait [#allocation4], 16  }
 0x21f   :  { %176 = vsyncadd [#allocation4], 4294967280 }
 0x220   :  { %139 = sfence }
 0x221   :  { %140 = vsyncpa [#allocation4], 1 }

</bundles_post_ra>
